<compile_context>
chip_gen: v5e
topology: v5e:2x2
jax: 0.10.0
libtpu: 0.0.40
codegen_flags: <defaults>
</compile_context>

<pallas_src>
import functools
import math

import jax
import jax.numpy as jnp
from jax.experimental import pallas as pl
from jax.experimental.pallas import tpu as pltpu


def _round_up(x, m):
    return ((x + m - 1) // m) * m


def _pick_tile(padded, align, max_tile):
    """Largest multiple of `align` that divides `padded` and is <= max_tile."""
    assert padded % align == 0
    t = min(max_tile, padded)
    t -= t % align
    t = max(t, align)
    while padded % t:
        t -= align
    return t


@functools.lru_cache(maxsize=None)
def _vmem_limit():
    # ~96 MiB on v5e/v6e (128 MiB physical), ~48 MiB on v7x (64 MiB physical).
    try:
        cap = int(pltpu.get_tpu_info().vmem_capacity_bytes)
    except Exception:
        cap = 64 * 1024 * 1024
    return int(min(cap * 3 // 4, 96 * 1024 * 1024))


# ---------------------------------------------------------------------------
# Pallas kernels
# ---------------------------------------------------------------------------
def _apply_act(x, act):
    """Epilogue activation in f32 (cast to output dtype happens at the store)."""
    if act == 'silu':            # x * sigmoid(x)
        return x / (1.0 + jnp.exp(-x))
    if act == 'lrelu':           # LeakyReLU(0.2)
        return jnp.where(x >= 0, x, 0.2 * x)
    if act == 'gelu':
        # TODO(synk): exact erf GELU; tanh approximation used so it fuses into
        # the matmul epilogue on the EUP slot (~1e-3 abs deviation).
        c = math.sqrt(2.0 / math.pi)
        return 0.5 * x * (1.0 + jnp.tanh(c * (x + 0.044715 * x * x * x)))
    return x


def _matmul_kernel(a_ref, b_ref, bias_ref, o_ref, acc_ref, *, act):
    """Batched matmul with fused bias + activation epilogue.

    blocks: a (1, tm, tk), b (1, tk, tn), bias (1, 1, tn) f32,
            o (1, tm, tn) out_dtype, acc scratch (tm, tn) f32.
    grid = (G, M_tiles, N_tiles, K_tiles); K innermost ("arbitrary").
    """
    @pl.when(pl.program_id(3) == 0)
    def _():
        acc_ref[...] = jnp.zeros_like(acc_ref)

    acc_ref[...] += jnp.dot(a_ref[0], b_ref[0],
                            preferred_element_type=jnp.float32)

    @pl.when(pl.program_id(3) == pl.num_programs(3) - 1)
    def _():
        r = acc_ref[...] + bias_ref[0]          # (tm, tn) + (1, tn)
        o_ref[0] = _apply_act(r, act).astype(o_ref.dtype)


def fused_matmul(a, b, bias=None, act='none', out_dtype=jnp.bfloat16,
                 compute_dtype=jnp.bfloat16, tm_max=512, tn_max=512, tk_max=1024):
    """a: (M, K) or (G, M, K); b: (K, N) shared or (G, K, N) per-group.

    MXU inputs in `compute_dtype` (bf16 by default), f32 accumulation, bias +
    activation fused into the epilogue.  Dims that fit the tile cap use
    full-dim blocks (no padding, no post-slice copies).
    """
    squeeze = (a.ndim == 2)
    if squeeze:
        a = a[None]
    if b.ndim == 2:
        b = b[None]
    G, M, K = a.shape
    Gb, Kb, N = b.shape
    assert Kb == K and Gb in (1, G)

    a = a.astype(compute_dtype)
    b = b.astype(compute_dtype)
    m_align = 16 if compute_dtype == jnp.bfloat16 else 8

    if M <= tm_max:
        Mp, tm = M, M
    else:
        Mp = _round_up(M, m_align)
        tm = _pick_tile(Mp, m_align, tm_max)
    if N <= tn_max:
        Np, tn = N, N
    else:
        Np = _round_up(N, 128)
        tn = _pick_tile(Np, 128, tn_max)
    if K <= tk_max:
        Kp, tk = K, K
    else:
        Kp = _round_up(K, 128)
        tk = _pick_tile(Kp, 128, tk_max)

    # v7x has two TensorCores: prefer >= 2 tiles along the parallel axes.
    if G * (Mp // tm) * (Np // tn) < 2 and Mp % m_align == 0 and Mp >= 2 * m_align:
        tm = _pick_tile(Mp, m_align, max(m_align, tm // 2))

    if (Mp, Kp) != (M, K):
        a = jnp.pad(a, ((0, 0), (0, Mp - M), (0, Kp - K)))
    if (Kp, Np) != (K, N):
        b = jnp.pad(b, ((0, 0), (0, Kp - K), (0, Np - N)))
    if bias is None:
        biasp = jnp.zeros((1, 1, Np), jnp.float32)
    else:
        biasp = jnp.pad(bias.astype(jnp.float32).reshape(1, 1, N),
                        ((0, 0), (0, 0), (0, Np - N)))

    if Gb == G and G > 1:
        b_map = lambda g, i, j, k: (g, k, j)     # per-group weights
    else:
        b_map = lambda g, i, j, k: (0, k, j)     # shared weights

    out = pl.pallas_call(
        functools.partial(_matmul_kernel, act=act),
        out_shape=jax.ShapeDtypeStruct((G, Mp, Np), out_dtype),
        grid=(G, Mp // tm, Np // tn, Kp // tk),
        in_specs=[pl.BlockSpec((1, tm, tk), lambda g, i, j, k: (g, i, k)),
                  pl.BlockSpec((1, tk, tn), b_map),
                  pl.BlockSpec((1, 1, tn), lambda g, i, j, k: (0, 0, j))],
        out_specs=pl.BlockSpec((1, tm, tn), lambda g, i, j, k: (g, i, j)),
        scratch_shapes=[pltpu.VMEM((tm, tn), jnp.float32)],
        compiler_params=pltpu.CompilerParams(
            dimension_semantics=("parallel", "parallel", "parallel", "arbitrary"),
            vmem_limit_bytes=_vmem_limit()),
    )(a, b, biasp)
    if (Mp, Np) != (M, N):
        out = out[:, :M, :N]
    return out[0] if squeeze else out


def _conv_direct_kernel(x_ref, w_ref, b_ref, o_ref, *, act, kh, kw, ho, wo, wo_c):
    """Direct (no im2col) stride-1 conv: accumulate kh*kw shifted 1x1 matmuls.

    x_ref: (1, Hp, Wp_c, Cin) bf16   -- full padded spatial map
    w_ref: (1, kh*kw, Cin, tn) bf16  -- per-tap (Cin, Cout) matrices
    b_ref: (1, 1, tn) f32
    o_ref: (1, ho, wo, tn)
    wo_c is wo rounded up to a multiple of 8 so in-kernel reshapes stay aligned.
    """
    cin = x_ref.shape[-1]
    tn = o_ref.shape[-1]
    x = x_ref[0]                                   # (Hp, Wp_c, Cin)
    hp = x.shape[0]
    acc = jnp.zeros((ho * wo_c, tn), jnp.float32)
    for j in range(kw):
        xj = x[:, j:j + wo_c, :].reshape(hp * wo_c, cin)
        for i in range(kh):
            acc = acc + jnp.dot(xj[i * wo_c:(i + ho) * wo_c, :],
                                w_ref[0, i * kw + j],
                                preferred_element_type=jnp.float32)
    r = _apply_act(acc + b_ref[0], act).astype(o_ref.dtype).reshape(ho, wo_c, tn)
    o_ref[0] = r[:, :wo, :] if wo_c != wo else r


def conv2d_direct(x, w, b=None, padding=0, act='none', per_sample=False,
                  out_dtype=jnp.bfloat16, tn_max=512):
    """Stride-1 conv, x: (B, H, W, Cin), w: (Cout, Cin, kh, kw) or (B, Cout, Cin, kh, kw).

    The input is only spatially padded (once); no im2col patch tensor is built.
    TODO(synk): halo row-tiling + Cin tiling for feature maps too large for one
    VMEM block, and fuse the nearest-2x upsample into the input index math.
    """
    B, H, W_, Cin = x.shape
    if per_sample:
        Gw, Cout, Cin_w, kh, kw = w.shape
        assert Gw == B
        wt = w.transpose(0, 3, 4, 2, 1).reshape(B, kh * kw, Cin, Cout)
    else:
        Cout, Cin_w, kh, kw = w.shape
        wt = w.transpose(2, 3, 1, 0).reshape(1, kh * kw, Cin, Cout)
    assert Cin_w == Cin
    Ho = H + 2 * padding - kh + 1
    Wo = W_ + 2 * padding - kw + 1
    Wo_c = _round_up(Wo, 8)                 # compute width (keeps reshapes aligned)
    Wp_c = Wo_c + kw - 1
    Hp = H + 2 * padding
    xp = jnp.pad(x.astype(jnp.bfloat16),
                 ((0, 0), (padding, padding),
                  (padding, Wp_c - W_ - padding), (0, 0)))
    wt = wt.astype(jnp.bfloat16)

    if Cout <= tn_max:
        Np, tn = Cout, Cout
    else:
        Np = _round_up(Cout, 128)
        tn = _pick_tile(Np, 128, tn_max)
        wt = jnp.pad(wt, ((0, 0), (0, 0), (0, 0), (0, Np - Cout)))
    if b is None:
        bias = jnp.zeros((1, 1, Np), jnp.float32)
    else:
        bias = jnp.pad(b.astype(jnp.float32).reshape(1, 1, Cout),
                       ((0, 0), (0, 0), (0, Np - Cout)))

    w_map = (lambda bb, n: (bb, 0, 0, n)) if per_sample else (lambda bb, n: (0, 0, 0, n))
    out = pl.pallas_call(
        functools.partial(_conv_direct_kernel, act=act, kh=kh, kw=kw,
                          ho=Ho, wo=Wo, wo_c=Wo_c),
        out_shape=jax.ShapeDtypeStruct((B, Ho, Wo, Np), out_dtype),
        grid=(B, Np // tn),
        in_specs=[pl.BlockSpec((1, Hp, Wp_c, Cin), lambda bb, n: (bb, 0, 0, 0)),
                  pl.BlockSpec((1, kh * kw, Cin, tn), w_map),
                  pl.BlockSpec((1, 1, tn), lambda bb, n: (0, 0, n))],
        out_specs=pl.BlockSpec((1, Ho, Wo, tn), lambda bb, n: (bb, 0, 0, n)),
        compiler_params=pltpu.CompilerParams(
            dimension_semantics=("parallel", "parallel"),
            vmem_limit_bytes=_vmem_limit()),
    )(xp, wt, bias)
    if Np != Cout:
        out = out[..., :Cout]
    return out


def _rmsnorm_kernel(x_ref, g_ref, o_ref, *, scale):
    x = x_ref[...].astype(jnp.float32)
    ss = jnp.sum(x * x, axis=-1, keepdims=True)
    # F.normalize clamps the L2 norm at 1e-12; clamping sum-of-squares at 1e-24
    # is equivalent except for identically-zero rows.
    inv = jax.lax.rsqrt(jnp.maximum(ss, 1e-24))
    g = g_ref[...].astype(jnp.float32) * scale
    o_ref[...] = (x * inv * g).astype(o_ref.dtype)


def _row_tile(R, max_tile=1024):
    if R % 8 == 0:
        return _pick_tile(R, 8, max_tile)
    return R if R <= max_tile else None


def rmsnorm_nhwc(x, g, out_dtype=jnp.bfloat16):
    """x: (B, H, W, C); F.normalize(channel dim) * g * sqrt(C). Row-tiled, no pad."""
    B, H, W, C = x.shape
    R = B * H * W
    xr = x.reshape(R, C)
    tr = _row_tile(R)
    if tr is None:                                  # rare fallback: pad rows
        Rp = _round_up(R, 8)
        xr = jnp.pad(xr, ((0, Rp - R), (0, 0)))
        tr = _pick_tile(Rp, 8, 1024)
    else:
        Rp = R
    out = pl.pallas_call(
        functools.partial(_rmsnorm_kernel, scale=math.sqrt(C)),
        out_shape=jax.ShapeDtypeStruct((Rp, C), out_dtype),
        grid=(Rp // tr,),
        in_specs=[pl.BlockSpec((tr, C), lambda i: (i, 0)),
                  pl.BlockSpec((1, C), lambda i: (0, 0))],
        out_specs=pl.BlockSpec((tr, C), lambda i: (i, 0)),
        compiler_params=pltpu.CompilerParams(
            dimension_semantics=("parallel",),
            vmem_limit_bytes=_vmem_limit()),
    )(xr, g.astype(jnp.float32).reshape(1, C))
    if Rp != R:
        out = out[:R]
    return out.reshape(B, H, W, C)


def _attn_kernel(qkv_ref, o_ref, *, heads, dim_head, tq, scale):
    """qkv_ref block: (1, N, 3*hidden) bf16 (q|k|v, head-major channels).
    o_ref block: (1, tq, hidden) -- lane-dense output, no head transposes."""
    hidden = heads * dim_head
    row0 = pl.program_id(1) * tq
    if tq % 8 == 0:
        row0 = pl.multiple_of(row0, 8)
    q_rows = qkv_ref[0, pl.ds(row0, tq), :]        # (tq, 3*hidden)
    kv = qkv_ref[0]                                # (N,  3*hidden)
    for h in range(heads):
        q = q_rows[:, h * dim_head:(h + 1) * dim_head] * scale   # scale folded into q
        k = kv[:, hidden + h * dim_head: hidden + (h + 1) * dim_head]
        v = kv[:, 2 * hidden + h * dim_head: 2 * hidden + (h + 1) * dim_head]
        s = jax.lax.dot_general(q, k, (((1,), (1,)), ((), ())),
                                preferred_element_type=jnp.float32)   # (tq, N)
        s = s - jnp.max(s, axis=-1, keepdims=True)
        p = jnp.exp(s)
        p = p * pl.reciprocal(jnp.sum(p, axis=-1, keepdims=True), approx=True)
        o = jnp.dot(p.astype(jnp.bfloat16), v, preferred_element_type=jnp.float32)
        o_ref[0, :, h * dim_head:(h + 1) * dim_head] = o.astype(o_ref.dtype)


def sdp_attention_fused(qkv, heads, dim_head):
    """qkv: (B, N, 3*hidden) in [q|k|v] head-major channel order -> (B, N, hidden).

    TODO(synk): online-softmax KV tiling (flash) for very long sequences; the
    score block here is (tq, N).
    """
    B, N, C3 = qkv.shape
    hidden = heads * dim_head
    assert C3 == 3 * hidden
    scale = 1.0 / math.sqrt(dim_head)
    qkv = qkv.astype(jnp.bfloat16)
    if N <= 256 or (N % 8):
        tq = N
    else:
        tq = _pick_tile(N, 8, 256)
    out = pl.pallas_call(
        functools.partial(_attn_kernel, heads=heads, dim_head=dim_head,
                          tq=tq, scale=scale),
        out_shape=jax.ShapeDtypeStruct((B, N, hidden), jnp.bfloat16),
        grid=(B, N // tq),
        in_specs=[pl.BlockSpec((1, N, 3 * hidden), lambda b, i: (b, 0, 0))],
        out_specs=pl.BlockSpec((1, tq, hidden), lambda b, i: (b, i, 0)),
        compiler_params=pltpu.CompilerParams(
            dimension_semantics=("parallel", "parallel"),
            vmem_limit_bytes=_vmem_limit()),
    )(qkv)
    return out


# ---------------------------------------------------------------------------
# NHWC glue ops built on the Pallas kernels
# ---------------------------------------------------------------------------
def _im2col_nhwc(x, kh, kw, stride, padding):
    """NHWC im2col in bf16 (only used for the stride-2 downsample convs).
    Returns (B, Ho*Wo, C*kh*kw), Ho, Wo; K-order = (c, i, j)."""
    x = x.astype(jnp.bfloat16)
    B, H, W, C = x.shape
    xp = jnp.pad(x, ((0, 0), (padding, padding), (padding, padding), (0, 0)))
    Ho = (H + 2 * padding - kh) // stride + 1
    Wo = (W + 2 * padding - kw) // stride + 1
    cols = []
    for i in range(kh):
        for j in range(kw):
            cols.append(xp[:, i:i + stride * Ho:stride, j:j + stride * Wo:stride, :])
    patches = jnp.stack(cols, axis=-1)                       # (B, Ho, Wo, C, kh*kw)
    return patches.reshape(B, Ho * Wo, C * kh * kw), Ho, Wo


def conv1x1(x, w_mat, b=None, act='none', out_dtype=jnp.bfloat16):
    """x: (B, H, W, Cin), w_mat: (Cin, Cout) -> (B, H, W, Cout)."""
    B, H, W, C = x.shape
    out = fused_matmul(x.reshape(B * H * W, C), w_mat, bias=b, act=act,
                       out_dtype=out_dtype)
    return out.reshape(B, H, W, w_mat.shape[-1])


def conv2d(x, w, b=None, stride=1, padding=0, act='none', out_dtype=jnp.bfloat16):
    """x: (B, H, W, Cin), w: (Cout, Cin, kh, kw) -> (B, Ho, Wo, Cout)."""
    if stride == 1:
        return conv2d_direct(x, w, b=b, padding=padding, act=act,
                             out_dtype=out_dtype)
    # TODO(synk): direct strided-tap kernel for the stride-2 downsample convs;
    # they are a small fraction of total conv work so im2col is kept here.
    B, H, W, C = x.shape
    Cout, Cin, kh, kw = w.shape
    patches, Ho, Wo = _im2col_nhwc(x, kh, kw, stride, padding)
    wmat = w.reshape(Cout, Cin * kh * kw).T                  # (K, Cout), K-order (c, i, j)
    out = fused_matmul(patches.reshape(B * Ho * Wo, Cin * kh * kw), wmat,
                       bias=b, act=act, out_dtype=out_dtype)
    return out.reshape(B, Ho, Wo, Cout)


def nearest_upsample_2x(x):
    """Single broadcast+reshape pass (no double jnp.repeat)."""
    B, H, W, C = x.shape
    x = jnp.broadcast_to(x[:, :, None, :, None, :], (B, H, 2, W, 2, C))
    return x.reshape(B, 2 * H, 2 * W, C)


def adaptive_conv_silu(fmap, weights_nk, mod, kernel_mod, eps=1e-8):
    """AdaptiveConv2DMod (adaptive=True, demod=True, kernel=3, stride=1) + SiLU.

    One batched direct-conv pallas_call (grid over samples); SiLU fused into
    the epilogue; no im2col.
    """
    b, H, W, Cin = fmap.shape
    nk, Cout, _, kh, kw = weights_nk.shape
    # per-sample weight modulation / demodulation (tiny) stays in plain JAX
    kernel_attn = jax.nn.softmax(kernel_mod.astype(jnp.float32), axis=-1)     # (b, nk)
    w = jnp.einsum('bn,noikl->boikl', kernel_attn, weights_nk.astype(jnp.float32))
    w = w * (mod.astype(jnp.float32)[:, None, :, None, None] + 1.0)
    inv_norm = jax.lax.rsqrt(
        jnp.maximum(jnp.sum(w * w, axis=(2, 3, 4), keepdims=True), eps))
    w = w * inv_norm                                                           # (b,o,i,kh,kw)
    pad = (kh - 1) // 2                        # get_same_padding(kernel=3, stride=1) == 1
    return conv2d_direct(fmap, w, b=None, padding=pad, act='silu',
                         per_sample=True, out_dtype=jnp.bfloat16)


# ---------------------------------------------------------------------------
# Module forwards (all NHWC internally)
# ---------------------------------------------------------------------------
def resnet_block_fwd(p, x, mods_iter):
    mod1, kmod1 = next(mods_iter), next(mods_iter)
    mod2, kmod2 = next(mods_iter), next(mods_iter)
    h = adaptive_conv_silu(x, p['block1_w'], mod1, kmod1)
    h = adaptive_conv_silu(h, p['block2_w'], mod2, kmod2)
    if p['res_conv'] is not None:
        res = conv1x1(x, p['res_conv']['w'], p['res_conv']['b'])
    else:
        res = x
    return h + res


def attention_fwd(p, x, heads, dim_head):
    B, H, W, C = x.shape
    hidden = heads * dim_head
    xn = rmsnorm_nhwc(x, p['norm_g'])
    qkv = conv1x1(xn, p['to_qkv']['w'], None)                 # (B, H, W, 3*hidden)
    out = sdp_attention_fused(qkv.reshape(B, H * W, 3 * hidden), heads, dim_head)
    out = out.reshape(B, H, W, hidden)                        # channels = head-major
    return conv1x1(out, p['to_out']['w'], p['to_out']['b'])


def feedforward_fwd(p, x):
    xn = rmsnorm_nhwc(x, p['norm_g'])
    h = conv1x1(xn, p['w1']['w'], p['w1']['b'], act='gelu')   # GELU fused in epilogue
    return conv1x1(h, p['w2']['w'], p['w2']['b'])


def transformer_fwd(p, x):
    for attn_p, ff_p in p['layers']:
        x = attention_fwd(attn_p, x, p['heads'], p['dim_head']) + x
        x = feedforward_fwd(ff_p, x) + x
    return x


def stylegan_fwd(p, x):
    x = x.astype(jnp.float32)
    norm = jnp.sqrt(jnp.sum(x * x, axis=1, keepdims=True))
    x = x / jnp.maximum(norm, 1e-12)
    for layer in p['layers']:
        # keep the style MLP in f32 (lr_mul-scaled weights are tiny; bf16 costs bits)
        x = fused_matmul(x, (layer['w'] * p['lr_mul']).T,
                         bias=layer['b'] * p['lr_mul'], act='lrelu',
                         out_dtype=jnp.float32, compute_dtype=jnp.float32)
    return x


def unet_forward(P, cfg, lowres_image, noise_aug_key, style_noise):
    x = lowres_image.astype(jnp.float32)
    noise_aug = jax.random.normal(noise_aug_key, x.shape, jnp.float32) * 0.001
    x = jnp.clip(x + noise_aug, 0.0, 1.0)
    x = x.transpose(0, 2, 3, 1)                              # NCHW -> NHWC (only here)

    styles = stylegan_fwd(P['style_net'], style_noise)
    mods_flat = fused_matmul(styles, P['style_to_mods']['w'].T,
                             bias=P['style_to_mods']['b'],
                             out_dtype=jnp.float32, compute_dtype=jnp.float32)
    splits, off = [], 0
    for d in P['style_dims']:
        splits.append(mods_flat[:, off:off + d])
        off += d
    mods_iter = iter(splits)

    x = conv2d(x, P['init_conv']['w'], P['init_conv']['b'], stride=1, padding=3)

    hlist = []
    for stage in P['downs']:
        for bp in stage['blocks']:
            x = resnet_block_fwd(bp, x, mods_iter)
            hlist.append(x)
        if stage['attn'] is not None:
            x = transformer_fwd(stage['attn'], x)
        x = conv2d(x, stage['down']['w'], stage['down']['b'], stride=2, padding=1)

    x = resnet_block_fwd(P['mid_block1'], x, mods_iter)
    x = transformer_fwd(P['mid_attn'], x)
    x = resnet_block_fwd(P['mid_block2'], x, mods_iter)

    skip_scale = 2.0 ** -0.5
    for stage in P['ups']:
        x = nearest_upsample_2x(x)
        # TODO(synk): fuse the nearest-2x upsample into up_conv's input indexing.
        x = conv2d(x, stage['up_conv']['w'], stage['up_conv']['b'], stride=1, padding=1)
        for bp in stage['blocks']:
            if hlist:
                res = hlist.pop() * skip_scale
                x = jnp.concatenate([x, res], axis=-1)       # channel concat (NHWC)
            x = resnet_block_fwd(bp, x, mods_iter)
        if stage['attn'] is not None:
            x = transformer_fwd(stage['attn'], x)

    x = resnet_block_fwd(P['final_res_block'], x, mods_iter)
    rgb = conv1x1(x, P['final_to_rgb']['w'], P['final_to_rgb']['b'],
                  out_dtype=jnp.float32)
    return rgb.transpose(0, 3, 1, 2)                         # NHWC -> NCHW


# ---------------------------------------------------------------------------
# Deterministic parameter construction (mirrors UnetUpsampler.__init__)
# ---------------------------------------------------------------------------
class KeyGen:
    def __init__(self, key):
        self._key = key

    def __call__(self):
        self._key, sub = jax.random.split(self._key)
        return sub


def _conv_p(kg, cin, cout, k):
    return {'w': jax.random.normal(kg(), (cout, cin, k, k), jnp.float32)
                 * (1.0 / math.sqrt(cin * k * k)),
            'b': jnp.zeros((cout,), jnp.float32)}


def _conv1x1_p(kg, cin, cout, bias=True):
    p = {'w': jax.random.normal(kg(), (cin, cout), jnp.float32) * (1.0 / math.sqrt(cin))}
    p['b'] = jnp.zeros((cout,), jnp.float32) if bias else None
    return p


def _resnet_p(kg, dim_in, dim_out, nk, style_dims):
    style_dims.extend([dim_in, nk, dim_out, nk])
    return {
        'block1_w': jax.random.normal(kg(), (nk, dim_out, dim_in, 3, 3), jnp.float32)
                    * (1.0 / math.sqrt(dim_in * 9)),
        'block2_w': jax.random.normal(kg(), (nk, dim_out, dim_out, 3, 3), jnp.float32)
                    * (1.0 / math.sqrt(dim_out * 9)),
        'res_conv': _conv1x1_p(kg, dim_in, dim_out) if dim_in != dim_out else None,
    }


def _transformer_p(kg, dim, dim_head, heads, depth, ff_mult=4):
    hidden = dim_head * heads
    layers = []
    for _ in range(depth):
        attn = {'norm_g': jnp.ones((dim,), jnp.float32),
                'to_qkv': _conv1x1_p(kg, dim, hidden * 3, bias=False),
                'to_out': _conv1x1_p(kg, hidden, dim)}
        ff = {'norm_g': jnp.ones((dim,), jnp.float32),
              'w1': _conv1x1_p(kg, dim, dim * ff_mult),
              'w2': _conv1x1_p(kg, dim * ff_mult, dim)}
        layers.append((attn, ff))
    return {'layers': layers, 'heads': heads, 'dim_head': dim_head}


def _stylegan_p(kg, s_cfg):
    dim_in, dim_out, depth = s_cfg['dim_in'], s_cfg['dim_out'], s_cfg['depth']
    layers = []
    for i in range(depth):
        d_in = dim_in if i == 0 else dim_out
        layers.append({'w': jax.random.normal(kg(), (dim_out, d_in), jnp.float32),
                       'b': jnp.zeros((dim_out,), jnp.float32)})
    return {'layers': layers, 'lr_mul': s_cfg.get('lr_mul', 0.1)}


def build_unet_params(cfg, kg):
    dim = cfg['dim']
    channels = cfg['channels']
    nk = cfg['num_conv_kernels']
    dim_head, heads = cfg['self_attn_dim_head'], cfg['self_attn_heads']
    init_dim = dim
    up_dims = [init_dim] + [dim * m for m in cfg['up_dim_mults']]
    init_down_dim = up_dims[len(cfg['up_dim_mults']) - len(cfg['down_dim_mults'])]
    down_dims = [init_down_dim] + [dim * m for m in cfg['down_dim_mults']]
    up_in_out = list(zip(up_dims[:-1], up_dims[1:]))
    down_in_out = list(zip(down_dims[:-1], down_dims[1:]))
    mid_dim = up_dims[-1]
    last_dim = up_dims[-1]
    block_count = 6
    style_dims = []

    P = {'init_conv': _conv_p(kg, channels, init_down_dim, 7)}

    downs = []
    for (dim_in, dim_out), fa, ad in zip(down_in_out, cfg['full_attn'], cfg['attn_depths']):
        blocks = [_resnet_p(kg, dim_in, dim_in, nk, style_dims) for _ in range(block_count)]
        attn = _transformer_p(kg, dim_in, dim_head, heads, ad) if fa else None
        downs.append({'blocks': blocks, 'attn': attn,
                      'down': _conv_p(kg, dim_in, dim_out, 3)})
    P['downs'] = downs

    P['mid_block1'] = _resnet_p(kg, mid_dim, mid_dim, nk, style_dims)
    P['mid_attn'] = _transformer_p(kg, mid_dim, dim_head, heads, cfg['mid_attn_depth'])
    P['mid_block2'] = _resnet_p(kg, mid_dim, mid_dim, nk, style_dims)

    ups = []
    for ind, ((dim_in, dim_out), fa, ad) in enumerate(
            zip(reversed(up_in_out), reversed(cfg['full_attn']), reversed(cfg['attn_depths']))):
        input_dim = dim_in * 2 if ind < len(down_in_out) else dim_in
        blocks = [_resnet_p(kg, input_dim, dim_in, nk, style_dims) for _ in range(block_count)]
        upsample_in = last_dim if ind == 0 else dim_out
        attn = _transformer_p(kg, dim_in, dim_head, heads, ad) if fa else None
        ups.append({'blocks': blocks, 'up_conv': _conv_p(kg, upsample_in, dim_in, 3),
                    'attn': attn})
    P['ups'] = ups

    P['final_res_block'] = _resnet_p(kg, dim, dim, nk, style_dims)
    P['final_to_rgb'] = _conv1x1_p(kg, dim, channels)

    P['style_net'] = _stylegan_p(kg, cfg['style_network'])
    total = sum(style_dims)
    P['style_to_mods'] = {
        'w': jax.random.normal(kg(), (total, cfg['style_network']['dim_out']), jnp.float32)
             * (1.0 / math.sqrt(cfg['style_network']['dim_out'])),
        'b': jnp.zeros((total,), jnp.float32)}
    P['style_dims'] = style_dims
    return P


# ---------------------------------------------------------------------------
if __name__ == "__main__":
    cfg = dict(
        dim=8,
        image_size=16,
        input_image_size=8,
        channels=3,
        up_dim_mults=(1, 2),
        down_dim_mults=(2,),
        full_attn=(False, True),
        attn_depths=(1, 1),
        mid_attn_depth=1,
        num_conv_kernels=4,
        self_attn_dim_head=8,
        self_attn_heads=2,
        style_network=dict(dim_in=16, dim_out=32, depth=2, lr_mul=0.1, dim_text_latent=0),
    )

    root = jax.random.PRNGKey(0)
    k_params, k_img, k_aug, k_style = jax.random.split(root, 4)
    P = build_unet_params(cfg, KeyGen(k_params))

    lowres = jax.random.uniform(
        k_img, (2, cfg['channels'], cfg['input_image_size'], cfg['input_image_size']),
        jnp.float32)
    style_noise = jax.random.normal(k_style, (2, cfg['style_network']['dim_in']), jnp.float32)

    rgb = unet_forward(P, cfg, lowres, k_aug, style_noise)
    rgb = jax.block_until_ready(rgb)
    assert rgb.shape == (2, cfg['channels'],
                         2 * cfg['input_image_size'], 2 * cfg['input_image_size'])
    assert bool(jnp.all(jnp.isfinite(rgb)))
    print("KERNEL_OK")
</pallas_src>

<mosaic_0001>
module attributes {stable_mosaic.version = 11 : i64} {
  func.func @_matmul_kernel(%arg0: i32, %arg1: i32, %arg2: i32, %arg3: i32, %arg4: memref<1x2x16xf32, #tpu.memory_space<vmem>>, %arg5: memref<1x16x32xf32, #tpu.memory_space<vmem>>, %arg6: memref<1x1x32xf32, #tpu.memory_space<vmem>>, %arg7: memref<1x2x32xf32, #tpu.memory_space<vmem>>, %arg8: memref<2x32xf32, #tpu.memory_space<vmem>>) attributes {dimension_semantics = [#tpu.dimension_semantics<parallel>, #tpu.dimension_semantics<parallel>, #tpu.dimension_semantics<parallel>, #tpu.dimension_semantics<arbitrary>], iteration_bounds = array<i64: 1, 1, 1, 1>, scalar_prefetch = 0 : i64, scratch_operands = 1 : i64, tpu.core_type = #tpu.core_type<tc>, window_params = [{transform_indices = @transform_0, window_bounds = array<i64: 1, 2, 16>}, {transform_indices = @transform_1, window_bounds = array<i64: 1, 16, 32>}, {transform_indices = @transform_2, window_bounds = array<i64: 1, 1, 32>}, {transform_indices = @transform_3, window_bounds = array<i64: 1, 2, 32>}]} {
    %c0_i32 = arith.constant 0 : i32
    %0 = arith.cmpi eq, %arg3, %c0_i32 : i32
    %1 = arith.extui %0 : i1 to i32
    %c0_i32_0 = arith.constant 0 : i32
    %2 = arith.cmpi ne, %1, %c0_i32_0 : i32
    scf.if %2 {
      %cst_12 = arith.constant 0.000000e+00 : f32
      %14 = vector.broadcast %cst_12 : f32 to vector<2x32xf32>
      %c0_13 = arith.constant 0 : index
      %c0_14 = arith.constant 0 : index
      %15 = vector.load %arg8[%c0_13, %c0_14] : memref<2x32xf32, #tpu.memory_space<vmem>>, vector<2x32xf32>
      tpu.vector_store %arg8[%c0_13, %c0_14], %14 {strides = array<i32>} : memref<2x32xf32, #tpu.memory_space<vmem>>, vector<2x32xf32>,
    } else {
    }
    %c0 = arith.constant 0 : index
    %c0_1 = arith.constant 0 : index
    %3 = vector.load %arg8[%c0, %c0_1] : memref<2x32xf32, #tpu.memory_space<vmem>>, vector<2x32xf32>
    %c0_2 = arith.constant 0 : index
    %c0_3 = arith.constant 0 : index
    %c0_4 = arith.constant 0 : index
    %4 = vector.load %arg4[%c0_2, %c0_3, %c0_4] : memref<1x2x16xf32, #tpu.memory_space<vmem>>, vector<1x2x16xf32>
    %5 = vector.shape_cast %4 : vector<1x2x16xf32> to vector<2x16xf32>
    %c0_5 = arith.constant 0 : index
    %c0_6 = arith.constant 0 : index
    %c0_7 = arith.constant 0 : index
    %6 = vector.load %arg5[%c0_5, %c0_6, %c0_7] : memref<1x16x32xf32, #tpu.memory_space<vmem>>, vector<1x16x32xf32>
    %7 = vector.shape_cast %6 : vector<1x16x32xf32> to vector<16x32xf32>
    %cst = arith.constant dense<0.000000e+00> : vector<2x32xf32>
    %8 = tpu.matmul %5, %7, %cst {dimension_numbers = #tpu.dot_dimension_numbers<[1], [0], [0], [1], [0, 0, 1, 1], [], []>} : vector<2x16xf32>, vector<16x32xf32>, vector<2x32xf32> -> vector<2x32xf32>
    %9 = arith.addf %3, %8 : vector<2x32xf32>
    %c0_8 = arith.constant 0 : index
    %c0_9 = arith.constant 0 : index
    %10 = vector.load %arg8[%c0_8, %c0_9] : memref<2x32xf32, #tpu.memory_space<vmem>>, vector<2x32xf32>
    tpu.vector_store %arg8[%c0_8, %c0_9], %9 {strides = array<i32>} : memref<2x32xf32, #tpu.memory_space<vmem>>, vector<2x32xf32>,
    %c0_i32_10 = arith.constant 0 : i32
    %11 = arith.cmpi eq, %arg3, %c0_i32_10 : i32
    %12 = arith.extui %11 : i1 to i32
    %c0_i32_11 = arith.constant 0 : i32
    %13 = arith.cmpi ne, %12, %c0_i32_11 : i32
    scf.if %13 {
      %c0_12 = arith.constant 0 : index
      %c0_13 = arith.constant 0 : index
      %14 = vector.load %arg8[%c0_12, %c0_13] : memref<2x32xf32, #tpu.memory_space<vmem>>, vector<2x32xf32>
      %c0_14 = arith.constant 0 : index
      %c0_15 = arith.constant 0 : index
      %c0_16 = arith.constant 0 : index
      %15 = vector.load %arg6[%c0_14, %c0_15, %c0_16] : memref<1x1x32xf32, #tpu.memory_space<vmem>>, vector<1x1x32xf32>
      %16 = vector.shape_cast %15 : vector<1x1x32xf32> to vector<1x32xf32>
      %17 = vector.broadcast %16 : vector<1x32xf32> to vector<2x32xf32>
      %18 = arith.addf %14, %17 : vector<2x32xf32>
      %cst_17 = arith.constant 0.000000e+00 : f32
      %19 = vector.broadcast %cst_17 : f32 to vector<2x32xf32>
      %20 = arith.cmpf oge, %18, %19 : vector<2x32xf32>
      %cst_18 = arith.constant 2.000000e-01 : f32
      %21 = vector.broadcast %cst_18 : f32 to vector<2x32xf32>
      %22 = arith.mulf %21, %18 : vector<2x32xf32>
      %23 = arith.select %20, %18, %22 : vector<2x32xi1>, vector<2x32xf32>
      %c0_19 = arith.constant 0 : index
      %c0_20 = arith.constant 0 : index
      %c0_21 = arith.constant 0 : index
      %24 = vector.load %arg7[%c0_19, %c0_20, %c0_21] : memref<1x2x32xf32, #tpu.memory_space<vmem>>, vector<1x2x32xf32>
      %25 = vector.shape_cast %24 : vector<1x2x32xf32> to vector<2x32xf32>
      %26 = vector.shape_cast %23 : vector<2x32xf32> to vector<1x2x32xf32>
      tpu.vector_store %arg7[%c0_19, %c0_20, %c0_21], %26 {strides = array<i32>} : memref<1x2x32xf32, #tpu.memory_space<vmem>>, vector<1x2x32xf32>,
    } else {
    }
    return
  }
  func.func @transform_0(%arg0: i32, %arg1: i32, %arg2: i32, %arg3: i32) -> (i32, i32, i32) {
    %c0_i32 = arith.constant 0 : i32
    return %arg0, %arg1, %arg3 : i32, i32, i32
  }
  func.func @transform_1(%arg0: i32, %arg1: i32, %arg2: i32, %arg3: i32) -> (i32, i32, i32) {
    %c0_i32 = arith.constant 0 : i32
    %c0_i32_0 = arith.constant 0 : i32
    return %c0_i32, %arg3, %arg2 : i32, i32, i32
  }
  func.func @transform_2(%arg0: i32, %arg1: i32, %arg2: i32, %arg3: i32) -> (i32, i32, i32) {
    %c0_i32 = arith.constant 0 : i32
    %c0_i32_0 = arith.constant 0 : i32
    %c0_i32_1 = arith.constant 0 : i32
    return %c0_i32, %c0_i32_0, %arg2 : i32, i32, i32
  }
  func.func @transform_3(%arg0: i32, %arg1: i32, %arg2: i32, %arg3: i32) -> (i32, i32, i32) {
    %c0_i32 = arith.constant 0 : i32
    return %arg0, %arg1, %arg2 : i32, i32, i32
  }
}

</mosaic_0001>

<bundles_post_ra>
// kernel: tpu_custom_call.1
= control target key start
LH: loop header
LB: loop body
LE: loop exit
PB: predicated region body
PF: predicated region fallthrough
CT: control target
= control target key end

     0   :  { %8 = vsyncpa [#allocation4], 0  ;;  %s240_s0 = inlined_call_operand.hbm [shape: f32[1,2,16], index: 0, kind: input, shape index: {}]   ;;  %s241_s1 = inlined_call_operand.hbm [shape: f32[1,16,32], index: 1, kind: input, shape index: {}]   ;;  %s242_s2 = inlined_call_operand.vmem [shape: f32[1,1,32], index: 2, kind: input, shape index: {}]   ;;  %s243_s3 = inlined_call_operand.hbm [shape: f32[1,2,32], index: 3, kind: output, shape index: {}]  }
   0x1   :  { %9 = vsyncpa [#allocation7], 0 }
   0x2   :  { %10 = vsyncpa [#allocation5], 0  ;;  %s16_s14 = sshll.u32 %s240_s0, 4  ;;  %s199_s15 = smov [#allocation3]   ;;  %s17_s14 = int_to_ptr.hbm [resolvable:$true] %s16_s14 }
   0x3   :  { %s18_s16 = sshll.u32 %s199_s15, 4  ;;  %s26_s19 = sshll.u32 %s241_s1, 4  ;;  %s19_s16 = int_to_ptr.vmem [resolvable:$true] %s18_s16  ;;  %s27_s19 = int_to_ptr.hbm [resolvable:$true] %s26_s19 }
   0x4   :  { %21 = dma.hbm_to_vmem [thread:$0]  %s17_s14, 32, %s19_s16, [#allocation4]  }
   0x5   :  { %s200_s20 = smov [#allocation6]   ;;  %s201_s22 = smov 128  }
   0x6   :  { %s28_s21 = sshll.u32 %s200_s20, 4  ;;  %s202_s23 = smov 8   ;;  %s29_s21 = int_to_ptr.vmem [resolvable:$true] %s28_s21 }
   0x7   :  { %34 = dma.hbm_to_vmem [thread:$0]  %s27_s19, 256, %s29_s21, [#allocation7], %s201_s22, %s201_s22, %s202_s23  }
   0x8   :  { %193 = dma.done.wait [#allocation4], 32  }
   0x9   :  { %194 = vsyncadd [#allocation4], 4294967264 }
   0xa   :  { %195 = dma.done.wait [#allocation7], 256  }
   0xb   :  { %196 = vsyncadd [#allocation7], 4294967040  ;;  %vm49_vm0 = vcmask 254976   ;;  %v203_v0 = vmov 0.0   ;;  %v54_v1 = vld [vmem:[#allocation6 + $0x8] sm:$0xff]  ;;  %v53_v2 = vld [vmem:[#allocation6] sm:$0xff] }
   0xc   :  { %50 = vst.msk [vmem:[#allocation2] sm:$0x3] %vm49_vm0, %v203_v0  ;;  %73 = vmatpush.msra.mxu0 %v54_v1  ;;  %v52_v3 = vld [vmem:[#allocation3] sm:$0x3]  ;;  %vm55_vm1 = vcmask 130048   ;;  %s204_s24 = smov [#allocation8]  }
   0xd   :  { %v120_v7 = vld [vmem:[%s242_s2] ss:$0 sm:$0xff]  ;;  %s100_s25 = sshll.u32 %s204_s24, 4  ;;  %s102_s28 = sshll.u32 %s243_s3, 4  ;;  %s101_s25 = int_to_ptr.vmem [resolvable:$true] %s100_s25  ;;  %s103_s28 = int_to_ptr.hbm [resolvable:$true] %s102_s28 }
   0xe   :  { %74 = vmatpush.msra.mxu0 %v53_v2 }
   0xf   :  { %113 = vmatmul.msk.f32.vlgmr.msra.gmra.mxu0 %vm55_vm1, %v52_v3 }
  0x13   :  { %v51_v4 = vld [vmem:[#allocation2] sm:$0x3] }
  0x8c   :  { %v76_v5 = vpop.f32.mrf.mxu0 }
  0x8d   :  { %v79_v6 = vadd.f32 %v76_v5, %v51_v4 }
  0x8f   :  { %81 = vst.msk [vmem:[#allocation2] sm:$0x3] %vm49_vm0, %v79_v6 }
  0x96   :  { %v85_v8 = vld [vmem:[#allocation2] sm:$0x3] }
  0x97   :  { %v90_v9 = vadd.f32 %v120_v7, %v85_v8 }
  0x99   :  { %vm91_vm2 = vcmp.ge.f32.partialorder %v90_v9, 0.0  ;;  %v92_v10 = vmul.f32 0.2, %v90_v9 }
  0x9b   :  { %v93_v11 = vsel %vm91_vm2, %v90_v9, %v92_v10 }
  0x9c   :  { %94 = vst.msk [vmem:[#allocation8] sm:$0x3] %vm49_vm0, %v93_v11 }
  0x9d   :  { %105 = dma.vmem_to_hbm [thread:$0]  %s101_s25, 32, %s103_s28, [#allocation5]  }
  0x9e   :  { %197 = dma.done.wait [#allocation5], 32  }
  0x9f   :  { %198 = vsyncadd [#allocation5], 4294967264 }
  0xa0   :  { %110 = vsyncpa [#allocation4], 1 }
  0xa1   :  { %111 = vsyncpa [#allocation7], 1 }
  0xa2   :  { %112 = vsyncpa [#allocation5], 1 }

</bundles_post_ra>
